<compile_context>
chip_gen: v6e
topology: v6e:2x2x1
jax: 0.10.0
libtpu: 0.0.40
codegen_flags: <defaults>
</compile_context>

<pallas_src>
import jax
import jax.numpy as jnp
from jax.experimental import pallas as pl
from jax.experimental.pallas import tpu as pltpu


# Scoped-VMEM ceiling: safe on v7x (64 MiB physical), generous vs the
# 16/32 MiB scoped defaults on v5e/v6e.
_VMEM_LIMIT_BYTES = 48 * 1024 * 1024
# Tile-selection budget: leave headroom under the limit above.
_VMEM_TILE_BUDGET = 40 * 1024 * 1024


def _round_up(x, m):
    return (x + m - 1) // m * m


def _pad2d(x, rows, cols):
    return jnp.pad(x, ((0, rows - x.shape[0]), (0, cols - x.shape[1])))


def _resize_rows(x, rows):
    """Slice or zero-pad the leading axis to `rows`."""
    if x.shape[0] == rows:
        return x
    if x.shape[0] > rows:
        return x[:rows]
    return jnp.pad(x, ((0, rows - x.shape[0]), (0, 0)))


def _pick_block_k(n, block_m, f_in_pad, f_out_pad,
                  budget_bytes=_VMEM_TILE_BUDGET):
    """Largest K tile (multiple of 128, capped at full K) whose footprint —
    double-buffered A and X tiles, resident W, output tile, f32 acc — fits
    the VMEM budget. Prefers block_k == full K (no reduction grid axis)."""
    full_k = _round_up(n, 128)
    fixed = (2 * f_in_pad * f_out_pad * 2        # W   (bf16, double-buffered)
             + 2 * block_m * f_out_pad * 2       # out (bf16, double-buffered)
             + block_m * f_in_pad * 4            # f32 accumulator scratch
             + 2 * f_out_pad * 4)                # bias
    for bk in (full_k, 8192, 4096, 2048, 1024, 512, 256, 128):
        if bk > full_k:
            continue
        stream = 2 * block_m * bk * 2 + 2 * bk * f_in_pad * 2   # A + X tiles
        if fixed + stream <= budget_bytes:
            return bk
    return 128


# ---------------------------------------------------------------------------
# Kernel 1: full-K fused GCNConv + ReLU   relu((A_tile @ X) @ W + b)
#   No reduction grid axis, no scratch accumulator.
#   a_ref : (tm, N_pad_k)        bf16
#   x_ref : (N_pad_k, Fin_pad)   bf16
#   w_ref : (Fin_pad, Fout_pad)  bf16
#   b_ref : (1, Fout_pad)        f32
#   o_ref : (tm, Fout_pad)       out dtype (lane-dense, 128-multiple)
# ---------------------------------------------------------------------------
def _fused_full_k_kernel(a_ref, x_ref, w_ref, b_ref, o_ref):
    agg = jnp.dot(a_ref[...], x_ref[...], preferred_element_type=jnp.float32)
    out = jnp.dot(agg.astype(w_ref.dtype), w_ref[...],
                  preferred_element_type=jnp.float32)
    o_ref[...] = jnp.maximum(out + b_ref[...], 0.0).astype(o_ref.dtype)


# ---------------------------------------------------------------------------
# Kernel 2: K-tiled fused GCNConv + ReLU  relu((sum_k A[i,k] @ X[k]) @ W + b)
#   acc_ref: (tm, Fin_pad) f32 VMEM scratch accumulator
# ---------------------------------------------------------------------------
def _fused_tiled_k_kernel(a_ref, x_ref, w_ref, b_ref, o_ref, acc_ref):
    k = pl.program_id(1)

    @pl.when(k == 0)
    def _():
        acc_ref[...] = jnp.zeros_like(acc_ref)

    acc_ref[...] += jnp.dot(a_ref[...], x_ref[...],
                            preferred_element_type=jnp.float32)

    @pl.when(k == pl.num_programs(1) - 1)
    def _():
        agg = acc_ref[...].astype(w_ref.dtype)            # bf16 for the MXU
        out = jnp.dot(agg, w_ref[...], preferred_element_type=jnp.float32)
        o_ref[...] = jnp.maximum(out + b_ref[...], 0.0).astype(o_ref.dtype)


# ---------------------------------------------------------------------------
# One fused GCNConv layer + ReLU on padded operands.
#   a_pad: [N_pad_m, N_pad_k] bf16, x_pad: [N_pad_k, Fin_pad] bf16
#   w: [Fin, Fout] f32, b: [Fout] f32
#   returns [N_pad_m, Fout_pad] in out_dtype
# ---------------------------------------------------------------------------
def gcn_layer(a_pad, x_pad, w, b, *, out_dtype=jnp.bfloat16,
              block_m=256, block_k=256):
    n_pad_m, n_pad_k = a_pad.shape
    f_in, f_out = w.shape
    f_in_pad = x_pad.shape[1]
    f_out_pad = _round_up(f_out, 128)

    w_pad = _pad2d(w.astype(jnp.float32), f_in_pad, f_out_pad).astype(jnp.bfloat16)
    b_pad = jnp.pad(b.astype(jnp.float32),
                    (0, f_out_pad - f_out)).reshape(1, f_out_pad)

    num_k = n_pad_k // block_k

    if num_k == 1:
        # Whole reduction in one tile: no K grid axis, no accumulator.
        return pl.pallas_call(
            _fused_full_k_kernel,
            out_shape=jax.ShapeDtypeStruct((n_pad_m, f_out_pad), out_dtype),
            grid_spec=pltpu.PrefetchScalarGridSpec(
                num_scalar_prefetch=0,
                grid=(n_pad_m // block_m,),
                in_specs=[
                    pl.BlockSpec((block_m, n_pad_k), lambda i: (i, 0)),
                    pl.BlockSpec((n_pad_k, f_in_pad), lambda i: (0, 0)),
                    pl.BlockSpec((f_in_pad, f_out_pad), lambda i: (0, 0)),
                    pl.BlockSpec((1, f_out_pad), lambda i: (0, 0)),
                ],
                out_specs=pl.BlockSpec((block_m, f_out_pad), lambda i: (i, 0)),
            ),
            compiler_params=pltpu.CompilerParams(
                dimension_semantics=("parallel",),
                vmem_limit_bytes=_VMEM_LIMIT_BYTES),
        )(a_pad, x_pad, w_pad, b_pad)

    # K-tiled reduction path (large graphs where full K would not fit VMEM).
    return pl.pallas_call(
        _fused_tiled_k_kernel,
        out_shape=jax.ShapeDtypeStruct((n_pad_m, f_out_pad), out_dtype),
        grid_spec=pltpu.PrefetchScalarGridSpec(
            num_scalar_prefetch=0,
            grid=(n_pad_m // block_m, num_k),
            in_specs=[
                pl.BlockSpec((block_m, block_k), lambda i, k: (i, k)),
                pl.BlockSpec((block_k, f_in_pad), lambda i, k: (k, 0)),
                pl.BlockSpec((f_in_pad, f_out_pad), lambda i, k: (0, 0)),
                pl.BlockSpec((1, f_out_pad), lambda i, k: (0, 0)),
            ],
            out_specs=pl.BlockSpec((block_m, f_out_pad), lambda i, k: (i, 0)),
            scratch_shapes=[pltpu.VMEM((block_m, f_in_pad), jnp.float32)],
        ),
        compiler_params=pltpu.CompilerParams(
            dimension_semantics=("parallel", "arbitrary"),
            vmem_limit_bytes=_VMEM_LIMIT_BYTES),
    )(a_pad, x_pad, w_pad, b_pad)


# ---------------------------------------------------------------------------
# Plain-JAX glue: D^{-1/2} (A + I) D^{-1/2} from edge_index
# (matches torch_geometric GCNConv default: add_self_loops=True, normalize=True)
# ---------------------------------------------------------------------------
def normalized_adjacency(edge_index, num_nodes):
    src = edge_index[0].astype(jnp.int32)
    dst = edge_index[1].astype(jnp.int32)
    loops = jnp.arange(num_nodes, dtype=jnp.int32)
    src = jnp.concatenate([src, loops])
    dst = jnp.concatenate([dst, loops])
    adj = jnp.zeros((num_nodes, num_nodes), jnp.float32).at[dst, src].add(1.0)
    deg = adj.sum(axis=1)
    d_inv_sqrt = jnp.where(deg > 0, 1.0 / jnp.sqrt(deg), 0.0)
    return d_inv_sqrt[:, None] * adj * d_inv_sqrt[None, :]


# ---------------------------------------------------------------------------
# GCN module forward (eval mode: dropout is identity)
# ---------------------------------------------------------------------------
def init_gcn_params(key, input_dim, hidden_dim):
    k1, k2 = jax.random.split(key)
    # conv1: input_dim -> 2*hidden_dim ; conv2: 2*hidden_dim -> hidden_dim
    w1 = jax.random.normal(k1, (input_dim, hidden_dim * 2), jnp.float32) * 0.1
    b1 = jnp.zeros((hidden_dim * 2,), jnp.float32)
    w2 = jax.random.normal(k2, (hidden_dim * 2, hidden_dim), jnp.float32) * 0.1
    b2 = jnp.zeros((hidden_dim,), jnp.float32)
    return {"w1": w1, "b1": b1, "w2": w2, "b2": b2}


def gcn_forward(params, x, edge_index, *, block_m=256, block_k=None):
    x = x.astype(jnp.float32)
    n, f_in = x.shape
    f1_out = params["w1"].shape[1]
    f2_out = params["w2"].shape[1]

    f_in_pad = _round_up(f_in, 128)
    f1_pad = _round_up(f1_out, 128)
    f2_pad = _round_up(f2_out, 128)

    # Independent padding of the row axis (block_m) and reduction axis (block_k).
    n_pad_m = _round_up(n, block_m)
    if block_k is None:
        block_k = _pick_block_k(n, block_m,
                                max(f_in_pad, f1_pad), max(f1_pad, f2_pad))
    n_pad_k = _round_up(n, block_k)

    a_hat = normalized_adjacency(edge_index, n)
    # bf16 A_hat, reused by both layers. Padded rows/cols are zero, so garbage
    # in padded rows of intermediate h cannot leak into valid outputs.
    a_pad = _pad2d(a_hat, n_pad_m, n_pad_k).astype(jnp.bfloat16)
    x_pad = _pad2d(x, n_pad_k, f_in_pad).astype(jnp.bfloat16)

    # conv1 + relu
    h = gcn_layer(a_pad, x_pad, params["w1"], params["b1"],
                  out_dtype=jnp.bfloat16, block_m=block_m, block_k=block_k)
    # TODO(synk): nn.Dropout(0.1) is identity in eval mode; training-mode
    # dropout (pltpu.prng_random_bits mask) is not implemented here.

    # conv2 + relu  (match h's row extent to A_hat's column padding)
    h_in = _resize_rows(h, n_pad_k)
    out = gcn_layer(a_pad, h_in, params["w2"], params["b2"],
                    out_dtype=jnp.bfloat16, block_m=block_m, block_k=block_k)
    return out[:n, :f2_out].astype(jnp.float32)


# ---------------------------------------------------------------------------
# Pure-JAX reference (mirrors the kernel's bf16 input quantization)
# ---------------------------------------------------------------------------
def gcn_reference(params, x, edge_index):
    q = lambda t: t.astype(jnp.bfloat16).astype(jnp.float32)
    x = x.astype(jnp.float32)
    n = x.shape[0]
    a = q(normalized_adjacency(edge_index, n))
    h = jnp.maximum(a @ q(x) @ q(params["w1"]) + params["b1"], 0.0)
    out = jnp.maximum(a @ q(h) @ q(params["w2"]) + params["b2"], 0.0)
    return out


if __name__ == "__main__":
    key = jax.random.PRNGKey(0)
    k_x, k_e, k_p = jax.random.split(key, 3)

    num_nodes = 200
    input_dim = 8
    hidden_dim = 16
    num_edges = 600

    x = jax.random.normal(k_x, (num_nodes, input_dim), jnp.float32)
    edge_index = jax.random.randint(k_e, (2, num_edges), 0, num_nodes, jnp.int32)
    params = init_gcn_params(k_p, input_dim, hidden_dim)

    ref = gcn_reference(params, x, edge_index)

    # Default path: large tiles, full-K fused kernel (no reduction grid axis).
    out = jax.jit(gcn_forward)(params, x, edge_index)
    out = jax.block_until_ready(out)
    assert out.shape == (num_nodes, hidden_dim), out.shape
    assert bool(jnp.all(out >= 0.0))          # ReLU output
    max_err = float(jnp.max(jnp.abs(out - ref)))
    assert max_err < 5e-2, f"full-K path: max abs err vs reference: {max_err}"

    # Also exercise the K-tiled accumulator path (forced small tiles -> 2x2 grid).
    tiled_fwd = jax.jit(
        lambda p, xx, ee: gcn_forward(p, xx, ee, block_m=128, block_k=128))
    out2 = jax.block_until_ready(tiled_fwd(params, x, edge_index))
    max_err2 = float(jnp.max(jnp.abs(out2 - ref)))
    assert max_err2 < 5e-2, f"tiled-K path: max abs err vs reference: {max_err2}"

    print("KERNEL_OK")
</pallas_src>

<mosaic_0001>
module attributes {stable_mosaic.version = 11 : i64} {
  func.func private @main(%arg0: i32) attributes {dimension_semantics = [#tpu.dimension_semantics<core_parallel>], iteration_bounds = array<i64: 2>, tpu.core_type = #tpu.core_type<sc_scalar_subcore>, window_params = []} {
    return
  }
}

module attributes {stable_mosaic.version = 11 : i64} {
  func.func private @main(%arg0: i32) attributes {dimension_semantics = [#tpu.dimension_semantics<core_parallel>], iteration_bounds = array<i64: 2>, tpu.core_type = #tpu.core_type<sc_scalar_subcore>, window_params = []} {
    return
  }
}

module attributes {stable_mosaic.version = 11 : i64} {
  func.func @_fused_full_k_kernel(%arg0: i32, %arg1: memref<256x256xbf16, #tpu.memory_space<vmem>>, %arg2: memref<256x128xbf16, #tpu.memory_space<vmem>>, %arg3: memref<128x128xbf16, #tpu.memory_space<vmem>>, %arg4: memref<1x128xf32, #tpu.memory_space<vmem>>, %arg5: memref<256x128xbf16, #tpu.memory_space<vmem>>) attributes {dimension_semantics = [#tpu.dimension_semantics<parallel>], iteration_bounds = array<i64: 1>, scalar_prefetch = 0 : i64, scratch_operands = 0 : i64, tpu.core_type = #tpu.core_type<tc>, window_params = [{transform_indices = @transform_0, window_bounds = array<i64: 256, 256>}, {pipeline_mode = #tpu.pipeline_mode<synchronous>, transform_indices = @transform_1, window_bounds = array<i64: 256, 128>}, {pipeline_mode = #tpu.pipeline_mode<synchronous>, transform_indices = @transform_2, window_bounds = array<i64: 128, 128>}, {pipeline_mode = #tpu.pipeline_mode<synchronous>, transform_indices = @transform_3, window_bounds = array<i64: 1, 128>}, {transform_indices = @transform_4, window_bounds = array<i64: 256, 128>}]} {
    %c0 = arith.constant 0 : index
    %c0_0 = arith.constant 0 : index
    %0 = vector.load %arg1[%c0, %c0_0] : memref<256x256xbf16, #tpu.memory_space<vmem>>, vector<256x256xbf16>
    %c0_1 = arith.constant 0 : index
    %c0_2 = arith.constant 0 : index
    %1 = vector.load %arg2[%c0_1, %c0_2] : memref<256x128xbf16, #tpu.memory_space<vmem>>, vector<256x128xbf16>
    %cst = arith.constant dense<0.000000e+00> : vector<256x128xf32>
    %2 = tpu.matmul %0, %1, %cst {dimension_numbers = #tpu.dot_dimension_numbers<[1], [0], [0], [1], [0, 0, 1, 1], [], []>} : vector<256x256xbf16>, vector<256x128xbf16>, vector<256x128xf32> -> vector<256x128xf32>
    %3 = arith.truncf %2 : vector<256x128xf32> to vector<256x128xbf16>
    %c0_3 = arith.constant 0 : index
    %c0_4 = arith.constant 0 : index
    %4 = vector.load %arg3[%c0_3, %c0_4] : memref<128x128xbf16, #tpu.memory_space<vmem>>, vector<128x128xbf16>
    %cst_5 = arith.constant dense<0.000000e+00> : vector<256x128xf32>
    %5 = tpu.matmul %3, %4, %cst_5 {dimension_numbers = #tpu.dot_dimension_numbers<[1], [0], [0], [1], [0, 0, 1, 1], [], []>} : vector<256x128xbf16>, vector<128x128xbf16>, vector<256x128xf32> -> vector<256x128xf32>
    %c0_6 = arith.constant 0 : index
    %c0_7 = arith.constant 0 : index
    %6 = vector.load %arg4[%c0_6, %c0_7] : memref<1x128xf32, #tpu.memory_space<vmem>>, vector<1x128xf32>
    %7 = vector.broadcast %6 : vector<1x128xf32> to vector<256x128xf32>
    %8 = arith.addf %5, %7 : vector<256x128xf32>
    %cst_8 = arith.constant 0.000000e+00 : f32
    %9 = vector.broadcast %cst_8 : f32 to vector<256x128xf32>
    %10 = arith.maximumf %8, %9 : vector<256x128xf32>
    %11 = arith.truncf %10 : vector<256x128xf32> to vector<256x128xbf16>
    %c0_9 = arith.constant 0 : index
    %c0_10 = arith.constant 0 : index
    %12 = vector.load %arg5[%c0_9, %c0_10] : memref<256x128xbf16, #tpu.memory_space<vmem>>, vector<256x128xbf16>
    tpu.vector_store %arg5[%c0_9, %c0_10], %11 {strides = array<i32>} : memref<256x128xbf16, #tpu.memory_space<vmem>>, vector<256x128xbf16>,
    return
  }
  func.func @transform_0(%arg0: i32) -> (i32, i32) {
    %c0_i32 = arith.constant 0 : i32
    %c0_i32_0 = arith.constant 0 : i32
    return %arg0, %c0_i32 : i32, i32
  }
  func.func @transform_1(%arg0: i32) -> (i32, i32) {
    %c0_i32 = arith.constant 0 : i32
    %c0_i32_0 = arith.constant 0 : i32
    %c0_i32_1 = arith.constant 0 : i32
    return %c0_i32, %c0_i32_0 : i32, i32
  }
  func.func @transform_2(%arg0: i32) -> (i32, i32) {
    %c0_i32 = arith.constant 0 : i32
    %c0_i32_0 = arith.constant 0 : i32
    %c0_i32_1 = arith.constant 0 : i32
    return %c0_i32, %c0_i32_0 : i32, i32
  }
  func.func @transform_3(%arg0: i32) -> (i32, i32) {
    %c0_i32 = arith.constant 0 : i32
    %c0_i32_0 = arith.constant 0 : i32
    %c0_i32_1 = arith.constant 0 : i32
    return %c0_i32, %c0_i32_0 : i32, i32
  }
  func.func @transform_4(%arg0: i32) -> (i32, i32) {
    %c0_i32 = arith.constant 0 : i32
    %c0_i32_0 = arith.constant 0 : i32
    return %arg0, %c0_i32 : i32, i32
  }
}

</mosaic_0001>

<bundles_post_ra>
// kernel: gcn_forward.2
= control target key start
LH: loop header
LB: loop body
LE: loop exit
PB: predicated region body
PF: predicated region fallthrough
CT: control target
= control target key end

     0   :  { %s1709_s1 = inlined_call_operand.vmem [shape: bf16[256,128], index: 1, kind: input, shape index: {}]   ;;  %s1710_s0 = inlined_call_operand.vmem [shape: bf16[256,256], index: 0, kind: input, shape index: {}]   ;;  %s1711_s2 = inlined_call_operand.vmem [shape: bf16[128,128], index: 2, kind: input, shape index: {}]   ;;  %s1712_s3 = inlined_call_operand.vmem [shape: f32[1,128], index: 3, kind: input, shape index: {}]   ;;  %s1713_s4 = inlined_call_operand.vmem [shape: bf16[256,128], index: 4, kind: output, shape index: {}]  }
   0x1   :  { %v1359_v0 = vld [vmem:[%s1709_s1 + $0x78] sm:$0xff]   ;;  %v1361_v2 = vld [vmem:[%s1709_s1 + $0x70] sm:$0xff]   ;;  %v1363_v4 = vld [vmem:[%s1709_s1 + $0x68] sm:$0xff]  }
   0x2   :  { %v1360_v1 = vld [vmem:[%s1709_s1 + $0x38] sm:$0xff]   ;;  %1159 = vmatprep.subr.bf16.mxu0 %v1359_v0  ;;  %1343 = vmatprep.subr.bf16.mxu1 %v1359_v0  ;;  %v1362_v3 = vld [vmem:[%s1709_s1 + $0x30] sm:$0xff]   ;;  %v1364_v5 = vld [vmem:[%s1709_s1 + $0x28] sm:$0xff]  }
   0x3   :  { %1160 = vmatpush3.bf16.msra.mxu0 %v1360_v1  ;;  %1351 = vmatpush3.bf16.msra.mxu1 %v1360_v1  ;;  %v1365_v6 = vld [vmem:[%s1709_s1 + $0x60] sm:$0xff]   ;;  %v1367_v8 = vld [vmem:[%s1709_s1 + $0x58] sm:$0xff]   ;;  %v1369_v10 = vld [vmem:[%s1709_s1 + $0x50] sm:$0xff]  }
   0x4   :  { %1161 = vmatprep.subr.bf16.mxu0 %v1361_v2  ;;  %1344 = vmatprep.subr.bf16.mxu1 %v1361_v2  ;;  %v1366_v7 = vld [vmem:[%s1709_s1 + $0x20] sm:$0xff]   ;;  %v1368_v9 = vld [vmem:[%s1709_s1 + $0x18] sm:$0xff]   ;;  %v1370_v12 = vld [vmem:[%s1709_s1 + $0x10] sm:$0xff]  }
   0x5   :  { %v1377_v11 = vld [vmem:[%s1710_s0 + $0x4] ss:$8 sps:$4 sm:$0xff]   ;;  %v1375_v17 = vld [vmem:[%s1710_s0] ss:$8 sps:$4 sm:$0xff]   ;;  %v1378_v19 = vld [vmem:[%s1710_s0 + $0x14] ss:$8 sps:$4 sm:$0xff]  }
   0x6   :  { %370 = vmatprep.mubr.bf16.mxu0 %v1377_v11  ;;  %v1371_v13 = vld [vmem:[%s1709_s1 + $0x48] sm:$0xff]   ;;  %v1373_v15 = vld [vmem:[%s1709_s1 + $0x40] sm:$0xff]   ;;  %v1411_v21 = vld [vmem:[%s1710_s0 + $0xd4] ss:$8 sps:$4 sm:$0xff]  }
   0x7   :  { %1162 = vmatpush3.bf16.msra.mxu0 %v1362_v3  ;;  %1352 = vmatpush3.bf16.msra.mxu1 %v1362_v3  ;;  %v1372_v14 = vld [vmem:[%s1709_s1 + $0x8] sm:$0xff]   ;;  %v1374_v16 = vld [vmem:[%s1709_s1] sm:$0xff]   ;;  %v1380_v22 = vld [vmem:[%s1710_s0 + $0x10] ss:$8 sps:$4 sm:$0xff]  }
   0x8   :  { %1163 = vmatprep.subr.bf16.mxu0 %v1363_v4  ;;  %1345 = vmatprep.subr.bf16.mxu1 %v1363_v4  ;;  %v1407_v18 = vld [vmem:[%s1710_s0 + $0xc4] ss:$8 sps:$4 sm:$0xff]   ;;  %v1405_v20 = vld [vmem:[%s1710_s0 + $0xc0] ss:$8 sps:$4 sm:$0xff]   ;;  %v1413_v24 = vld [vmem:[%s1710_s0 + $0xd0] ss:$8 sps:$4 sm:$0xff]  }
   0x9   :  { %466 = vmatprep.mubr.bf16.mxu1 %v1407_v18  ;;  %v1381_v23 = vld [vmem:[%s1710_s0 + $0x24] ss:$8 sps:$4 sm:$0xff]   ;;  %v1423_v25 = vld [vmem:[%s1711_s2 + $0x38] sm:$0xff]   ;;  %v1424_v26 = vld [vmem:[%s1711_s2 + $0x30] sm:$0xff]  }
   0xa   :  { %v1417_v27 = vld [vmem:[%s1710_s0 + $0xe4] ss:$8 sps:$4 sm:$0xff]   ;;  %v1383_v29 = vld [vmem:[%s1710_s0 + $0x20] ss:$8 sps:$4 sm:$0xff]   ;;  %v1384_v31 = vld [vmem:[%s1710_s0 + $0x34] ss:$8 sps:$4 sm:$0xff]  }
   0xb   :  { %1164 = vmatpush3.bf16.msra.mxu0 %v1364_v5  ;;  %1353 = vmatpush3.bf16.msra.mxu1 %v1364_v5  ;;  %v1425_v28 = vld [vmem:[%s1711_s2 + $0x28] sm:$0xff]   ;;  %v1426_v30 = vld [vmem:[%s1711_s2 + $0x20] sm:$0xff]   ;;  %v1420_v33 = vld [vmem:[%s1710_s0 + $0xf4] ss:$8 sps:$4 sm:$0xff]  }
   0xc   :  { %1165 = vmatprep.subr.bf16.mxu0 %v1365_v6  ;;  %1346 = vmatprep.subr.bf16.mxu1 %v1365_v6  ;;  %v1419_v32 = vld [vmem:[%s1710_s0 + $0xe0] ss:$8 sps:$4 sm:$0xff]   ;;  %v1386_v34 = vld [vmem:[%s1710_s0 + $0x30] ss:$8 sps:$4 sm:$0xff]   ;;  %v1387_v35 = vld [vmem:[%s1710_s0 + $0x44] ss:$8 sps:$4 sm:$0xff]  }
   0xd   :  { %v1422_v36 = vld [vmem:[%s1710_s0 + $0xf0] ss:$8 sps:$4 sm:$0xff]   ;;  %v1389_v37 = vld [vmem:[%s1710_s0 + $0x40] ss:$8 sps:$4 sm:$0xff]   ;;  %v1390_v38 = vld [vmem:[%s1710_s0 + $0x54] ss:$8 sps:$4 sm:$0xff]  }
   0xe   :  { %v1392_v39 = vld [vmem:[%s1710_s0 + $0x50] ss:$8 sps:$4 sm:$0xff]   ;;  %v1393_v40 = vld [vmem:[%s1710_s0 + $0x64] ss:$8 sps:$4 sm:$0xff]   ;;  %v1395_v41 = vld [vmem:[%s1710_s0 + $0x60] ss:$8 sps:$4 sm:$0xff]  }
   0xf   :  { %1166 = vmatpush3.bf16.msra.mxu0 %v1366_v7  ;;  %1354 = vmatpush3.bf16.msra.mxu1 %v1366_v7  ;;  %v1396_v42 = vld [vmem:[%s1710_s0 + $0x74] ss:$8 sps:$4 sm:$0xff]   ;;  %v1398_v43 = vld [vmem:[%s1710_s0 + $0x70] ss:$8 sps:$4 sm:$0xff]   ;;  %v1399_v44 = vld [vmem:[%s1710_s0 + $0x84] ss:$8 sps:$4 sm:$0xff]  }
  0x10   :  { %1167 = vmatprep.subr.bf16.mxu0 %v1367_v8  ;;  %1347 = vmatprep.subr.bf16.mxu1 %v1367_v8  ;;  %v1401_v45 = vld [vmem:[%s1710_s0 + $0x80] ss:$8 sps:$4 sm:$0xff]   ;;  %v1402_v46 = vld [vmem:[%s1710_s0 + $0x94] ss:$8 sps:$4 sm:$0xff]   ;;  %v1404_v48 = vld [vmem:[%s1710_s0 + $0x90] ss:$8 sps:$4 sm:$0xff]  }
  0x11   :  { %v1427_v47 = vld [vmem:[%s1711_s2 + $0x18] sm:$0xff]   ;;  %v1408_v49 = vld [vmem:[%s1710_s0 + $0xa4] ss:$8 sps:$4 sm:$0xff]   ;;  %v1428_v50 = vld [vmem:[%s1711_s2 + $0x10] sm:$0xff]  }
  0x12   :  { %v1429_v51 = vld [vmem:[%s1711_s2 + $0x8] sm:$0xff]   ;;  %v1414_v53 = vld [vmem:[%s1710_s0 + $0xb4] ss:$8 sps:$4 sm:$0xff]   ;;  %v1430_v54 = vld [vmem:[%s1711_s2] sm:$0xff]  }
  0x13   :  { %1168 = vmatpush3.bf16.msra.mxu0 %v1368_v9  ;;  %1355 = vmatpush3.bf16.msra.mxu1 %v1368_v9  ;;  %v1410_v52 = vld [vmem:[%s1710_s0 + $0xa0] ss:$8 sps:$4 sm:$0xff]   ;;  %v1416_v55 = vld [vmem:[%s1710_s0 + $0xb0] ss:$8 sps:$4 sm:$0xff]  }
  0x14   :  { %1169 = vmatprep.subr.bf16.mxu0 %v1369_v10  ;;  %1348 = vmatprep.subr.bf16.mxu1 %v1369_v10 }
  0x17   :  { %1170 = vmatpush3.bf16.msra.mxu0 %v1370_v12  ;;  %1356 = vmatpush3.bf16.msra.mxu1 %v1370_v12 }
  0x18   :  { %1171 = vmatprep.subr.bf16.mxu0 %v1371_v13  ;;  %1349 = vmatprep.subr.bf16.mxu1 %v1371_v13 }
  0x1b   :  { %1172 = vmatpush3.bf16.msra.mxu0 %v1372_v14  ;;  %1357 = vmatpush3.bf16.msra.mxu1 %v1372_v14 }
  0x1c   :  { %1173 = vmatprep.subr.bf16.mxu0 %v1373_v15  ;;  %1350 = vmatprep.subr.bf16.mxu1 %v1373_v15 }
  0x1f   :  { %1174 = vmatpush3.bf16.msra.mxu0 %v1374_v16  ;;  %1358 = vmatpush3.bf16.msra.mxu1 %v1374_v16 }
  0x20   :  { %1295 = vmatprep.subr.bf16.mxu1 %v1423_v25 }
  0x22   :  { %371 = vmatmul.mubr.bf16.vlgmr.msra.gmra.mxu0 %v1375_v17  ;;  %467 = vmatmul.mubr.bf16.vlgmr.msra.gmra.mxu1 %v1405_v20 }
  0x23   :  { %378 = vmatprep.mubr.bf16.mxu0 %v1378_v19  ;;  %474 = vmatprep.mubr.bf16.mxu1 %v1411_v21 }
  0x24   :  { %1296 = vmatpush3.bf16.msra.mxu1 %v1423_v25 }
  0x25   :  { %1297 = vmatprep.subr.bf16.mxu1 %v1424_v26 }
  0x28   :  { %1298 = vmatpush3.bf16.msra.mxu1 %v1424_v26 }
  0x29   :  { %1299 = vmatprep.subr.bf16.mxu1 %v1425_v28 }
  0x2a   :  { %379 = vmatmul.mubr.bf16.gmra.mxu0 %v1380_v22  ;;  %475 = vmatmul.mubr.bf16.gmra.mxu1 %v1413_v24 }
  0x2b   :  { %386 = vmatprep.mubr.bf16.mxu0 %v1381_v23  ;;  %482 = vmatprep.mubr.bf16.mxu1 %v1417_v27 }
  0x2c   :  { %1300 = vmatpush3.bf16.msra.mxu1 %v1425_v28 }
  0x2d   :  { %1301 = vmatprep.subr.bf16.mxu1 %v1426_v30 }
  0x30   :  { %1302 = vmatpush3.bf16.msra.mxu1 %v1426_v30 }
  0x31   :  { %1303 = vmatprep.subr.bf16.mxu1 %v1427_v47 }
  0x32   :  { %387 = vmatmul.mubr.bf16.gmra.mxu0 %v1383_v29  ;;  %483 = vmatmul.mubr.bf16.gmra.mxu1 %v1419_v32 }
  0x33   :  { %394 = vmatprep.mubr.bf16.mxu0 %v1384_v31  ;;  %490 = vmatprep.mubr.bf16.mxu1 %v1420_v33 }
  0x34   :  { %1304 = vmatpush3.bf16.msra.mxu1 %v1427_v47 }
  0x35   :  { %1305 = vmatprep.subr.bf16.mxu1 %v1428_v50 }
  0x38   :  { %1306 = vmatpush3.bf16.msra.mxu1 %v1428_v50 }
  0x39   :  { %1307 = vmatprep.subr.bf16.mxu1 %v1429_v51 }
  0x3a   :  { %395 = vmatmul.mubr.bf16.gmra.mxu0 %v1386_v34  ;;  %491 = vmatmul.mubr.bf16.gmra.mxu1 %v1422_v36 }
  0x3b   :  { %402 = vmatprep.mubr.bf16.mxu0 %v1387_v35 }
  0x3c   :  { %1308 = vmatpush3.bf16.msra.mxu1 %v1429_v51 }
  0x3d   :  { %1309 = vmatprep.subr.bf16.mxu1 %v1430_v54 }
  0x40   :  { %1310 = vmatpush3.bf16.msra.mxu1 %v1430_v54 }
  0x42   :  { %403 = vmatmul.mubr.bf16.gmra.mxu0 %v1389_v37 }
  0x43   :  { %410 = vmatprep.mubr.bf16.mxu0 %v1390_v38 }
  0x4a   :  { %411 = vmatmul.mubr.bf16.gmra.mxu0 %v1392_v39 }
  0x4b   :  { %418 = vmatprep.mubr.bf16.mxu0 %v1393_v40 }
  0x52   :  { %419 = vmatmul.mubr.bf16.gmra.mxu0 %v1395_v41 }
  0x53   :  { %426 = vmatprep.mubr.bf16.mxu0 %v1396_v42 }
  0x5a   :  { %427 = vmatmul.mubr.bf16.gmra.mxu0 %v1398_v43 }
  0x5b   :  { %434 = vmatprep.mubr.bf16.mxu0 %v1399_v44 }
  0x62   :  { %435 = vmatmul.mubr.bf16.gmra.mxu0 %v1401_v45 }
  0x63   :  { %442 = vmatprep.mubr.bf16.mxu0 %v1402_v46 }
  0x6a   :  { %443 = vmatmul.mubr.bf16.gmra.mxu0 %v1404_v48 }
  0x6b   :  { %450 = vmatprep.mubr.bf16.mxu0 %v1408_v49 }
  0x72   :  { %451 = vmatmul.mubr.bf16.gmra.mxu0 %v1410_v52 }
  0x73   :  { %458 = vmatprep.mubr.bf16.mxu0 %v1414_v53 }
  0x7a   :  { %459 = vmatmul.mubr.bf16.gmra.mxu0 %v1416_v55 }
  0xe2   :  { %v1175_v56 = vpop.f32.mrf.mxu0  ;;  %v1247_v31 = vpop.f32.mrf.mxu1 }
  0xe4   :  { %v1176_v57 = vpop.f32.mrf.mxu0  ;;  %v1248_v37 = vpop.f32.mrf.mxu1 }
  0xe5   :  { %v1177_v60 = vadd.f32 %v1176_v57, %v1175_v56 }
  0xe6   :  { %v1178_v58 = vpop.f32.mrf.mxu0  ;;  %v1250_v40 = vpop.f32.mrf.mxu1 }
  0xe8   :  { %v1179_v59 = vpop.f32.mrf.mxu0  ;;  %v1251_v46 = vpop.f32.mrf.mxu1 }
  0xe9   :  { %v1180_v61 = vadd.f32 %v1179_v59, %v1178_v58 }
  0xea   :  { %v1181_v62 = vpop.f32.mrf.mxu0  ;;  %v1253_v49 = vpop.f32.mrf.mxu1 }
  0xeb   :  { %v499_v63 = vpack.c.bf16 %v1180_v61, %v1177_v60 }
  0xec   :  { %v1182_v0 = vpop.f32.mrf.mxu0  ;;  %v1254_v55 = vpop.f32.mrf.mxu1 }
  0xed   :  { %1311 = vmatprep.mubr.bf16.mxu1 %v499_v63  ;;  %v1183_v3 = vadd.f32 %v1182_v0, %v1181_v62 }
  0xee   :  { %v1184_v1 = vpop.f32.mrf.mxu0  ;;  %v1256_v58 = vpop.f32.mrf.mxu1 }
  0xf0   :  { %v1185_v2 = vpop.f32.mrf.mxu0  ;;  %v1257_v0 = vpop.f32.mrf.mxu1 }
  0xf1   :  { %v1186_v4 = vadd.f32 %v1185_v2, %v1184_v1 }
  0xf2   :  { %v1187_v5 = vpop.f32.mrf.mxu0 }
  0xf3   :  { %v500_v6 = vpack.c.bf16 %v1186_v4, %v1183_v3  ;;  %v1259_v3 = vpop.f32.mrf.mxu1 }
  0xf4   :  { %v1188_v7 = vpop.f32.mrf.mxu0 }
  0xf5   :  { %1312 = vmatmul.mubr.bf16.vlgmr.msra.gmra.mxu1 %v500_v6  ;;  %v1189_v10 = vadd.f32 %v1188_v7, %v1187_v5 }
  0xf6   :  { %v1190_v8 = vpop.f32.mrf.mxu0 }
  0xf8   :  { %v1191_v9 = vpop.f32.mrf.mxu0 }
  0xf9   :  { %v1192_v11 = vadd.f32 %v1191_v9, %v1190_v8  ;;  %v1260_v9 = vpop.f32.mrf.mxu1 }
  0xfa   :  { %v1193_v12 = vpop.f32.mrf.mxu0 }
  0xfb   :  { %v501_v13 = vpack.c.bf16 %v1192_v11, %v1189_v10 }
  0xfc   :  { %v1194_v14 = vpop.f32.mrf.mxu0 }
  0xfd   :  { %1315 = vmatprep.mubr.bf16.mxu1 %v501_v13  ;;  %v1195_v17 = vadd.f32 %v1194_v14, %v1193_v12  ;;  %v1262_v12 = vpop.f32.mrf.mxu1 }
  0xfe   :  { %v1196_v15 = vpop.f32.mrf.mxu0 }
 0x100   :  { %v1197_v16 = vpop.f32.mrf.mxu0 }
 0x101   :  { %v1198_v18 = vadd.f32 %v1197_v16, %v1196_v15 }
 0x102   :  { %v1199_v19 = vpop.f32.mrf.mxu0 }
 0x103   :  { %v502_v20 = vpack.c.bf16 %v1198_v18, %v1195_v17  ;;  %v1263_v18 = vpop.f32.mrf.mxu1 }
 0x104   :  { %v1200_v21 = vpop.f32.mrf.mxu0 }
 0x105   :  { %1316 = vmatmul.mubr.bf16.gmra.mxu1 %v502_v20  ;;  %v1201_v24 = vadd.f32 %v1200_v21, %v1199_v19  ;;  %v1249_v20 = vadd.f32 %v1248_v37, %v1247_v31  ;;  %v1252_v21 = vadd.f32 %v1251_v46, %v1250_v40 }
 0x106   :  { %v1202_v22 = vpop.f32.mrf.mxu0 }
 0x108   :  { %v1203_v23 = vpop.f32.mrf.mxu0 }
 0x109   :  { %v1204_v25 = vadd.f32 %v1203_v23, %v1202_v22  ;;  %v1265_v23 = vpop.f32.mrf.mxu1 }
 0x10a   :  { %v1205_v26 = vpop.f32.mrf.mxu0 }
 0x10b   :  { %v503_v27 = vpack.c.bf16 %v1204_v25, %v1201_v24 }
 0x10c   :  { %v1206_v28 = vpop.f32.mrf.mxu0 }
 0x10d   :  { %1319 = vmatprep.mubr.bf16.mxu1 %v503_v27  ;;  %v1207_v32 = vadd.f32 %v1206_v28, %v1205_v26  ;;  %v511_v27 = vpack.c.bf16 %v1252_v21, %v1249_v20  ;;  %v1266_v28 = vpop.f32.mrf.mxu1 }
 0x10e   :  { %v1208_v29 = vpop.f32.mrf.mxu0  ;;  %v1267_v31 = vadd.f32 %v1266_v28, %v1265_v23 }
 0x110   :  { %v1209_v30 = vpop.f32.mrf.mxu0 }
 0x111   :  { %v1210_v33 = vadd.f32 %v1209_v30, %v1208_v29  ;;  %v1255_v29 = vadd.f32 %v1254_v55, %v1253_v49  ;;  %v1258_v30 = vadd.f32 %v1257_v0, %v1256_v58 }
 0x112   :  { %v1211_v34 = vpop.f32.mrf.mxu0 }
 0x113   :  { %v504_v35 = vpack.c.bf16 %v1210_v33, %v1207_v32  ;;  %v1261_v32 = vadd.f32 %v1260_v9, %v1259_v3  ;;  %v1264_v33 = vadd.f32 %v1263_v18, %v1262_v12 }
 0x114   :  { %v1212_v36 = vpop.f32.mrf.mxu0 }
 0x115   :  { %1320 = vmatmul.mubr.bf16.gmra.mxu1 %v504_v35  ;;  %v1213_v41 = vadd.f32 %v1212_v36, %v1211_v34  ;;  %v1268_v34 = vpop.f32.mrf.mxu1  ;;  %v512_v35 = vpack.c.bf16 %v1258_v30, %v1255_v29  ;;  %v513_v36 = vpack.c.bf16 %v1264_v33, %v1261_v32 }
 0x116   :  { %v1214_v38 = vpop.f32.mrf.mxu0 }
 0x118   :  { %v1215_v39 = vpop.f32.mrf.mxu0 }
 0x119   :  { %v1216_v42 = vadd.f32 %v1215_v39, %v1214_v38  ;;  %v1269_v38 = vpop.f32.mrf.mxu1 }
 0x11a   :  { %v1217_v43 = vpop.f32.mrf.mxu0  ;;  %v1270_v37 = vadd.f32 %v1269_v38, %v1268_v34 }
 0x11b   :  { %v505_v44 = vpack.c.bf16 %v1216_v42, %v1213_v41  ;;  %v1627_v41 = vld [vmem:[%s1712_s3] ss:$0 sm:$0xff] }
 0x11c   :  { %v1218_v45 = vpop.f32.mrf.mxu0  ;;  %v514_v39 = vpack.c.bf16 %v1270_v37, %v1267_v31 }
 0x11d   :  { %1323 = vmatprep.mubr.bf16.mxu1 %v505_v44  ;;  %v1219_v50 = vadd.f32 %v1218_v45, %v1217_v43 }
 0x11e   :  { %v1220_v47 = vpop.f32.mrf.mxu0 }
 0x120   :  { %v1221_v48 = vpop.f32.mrf.mxu0 }
 0x121   :  { %v1222_v51 = vadd.f32 %v1221_v48, %v1220_v47 }
 0x122   :  { %v1223_v52 = vpop.f32.mrf.mxu0 }
 0x123   :  { %v506_v53 = vpack.c.bf16 %v1222_v51, %v1219_v50 }
 0x124   :  { %v1224_v54 = vpop.f32.mrf.mxu0 }
 0x125   :  { %1324 = vmatmul.mubr.bf16.gmra.mxu1 %v506_v53  ;;  %v1225_v59 = vadd.f32 %v1224_v54, %v1223_v52 }
 0x126   :  { %v1226_v56 = vpop.f32.mrf.mxu0 }
 0x128   :  { %v1227_v57 = vpop.f32.mrf.mxu0 }
 0x129   :  { %v1228_v60 = vadd.f32 %v1227_v57, %v1226_v56 }
 0x12a   :  { %v1229_v61 = vpop.f32.mrf.mxu0 }
 0x12b   :  { %v507_v62 = vpack.c.bf16 %v1228_v60, %v1225_v59 }
 0x12c   :  { %v1230_v63 = vpop.f32.mrf.mxu0 }
 0x12d   :  { %1327 = vmatprep.mubr.bf16.mxu1 %v507_v62  ;;  %v1231_v4 = vadd.f32 %v1230_v63, %v1229_v61 }
 0x12e   :  { %v1232_v1 = vpop.f32.mrf.mxu0 }
 0x130   :  { %v1233_v2 = vpop.f32.mrf.mxu0 }
 0x131   :  { %v1234_v5 = vadd.f32 %v1233_v2, %v1232_v1 }
 0x132   :  { %v1235_v6 = vpop.f32.mrf.mxu0 }
 0x133   :  { %v508_v7 = vpack.c.bf16 %v1234_v5, %v1231_v4 }
 0x134   :  { %v1236_v8 = vpop.f32.mrf.mxu0 }
 0x135   :  { %1328 = vmatmul.mubr.bf16.gmra.mxu1 %v508_v7  ;;  %v1237_v13 = vadd.f32 %v1236_v8, %v1235_v6 }
 0x136   :  { %v1238_v10 = vpop.f32.mrf.mxu0 }
 0x138   :  { %v1239_v11 = vpop.f32.mrf.mxu0 }
 0x139   :  { %v1240_v14 = vadd.f32 %v1239_v11, %v1238_v10 }
 0x13a   :  { %v1241_v15 = vpop.f32.mrf.mxu0 }
 0x13b   :  { %v509_v16 = vpack.c.bf16 %v1240_v14, %v1237_v13 }
 0x13c   :  { %v1242_v17 = vpop.f32.mrf.mxu0 }
 0x13d   :  { %1331 = vmatprep.mubr.bf16.mxu1 %v509_v16  ;;  %v1243_v24 = vadd.f32 %v1242_v17, %v1241_v15 }
 0x13e   :  { %v1244_v19 = vpop.f32.mrf.mxu0 }
 0x140   :  { %v1245_v22 = vpop.f32.mrf.mxu0 }
 0x141   :  { %v1246_v25 = vadd.f32 %v1245_v22, %v1244_v19 }
 0x143   :  { %v510_v26 = vpack.c.bf16 %v1246_v25, %v1243_v24 }
 0x145   :  { %1332 = vmatmul.mubr.bf16.gmra.mxu1 %v510_v26 }
 0x146   :  { %1335 = vmatprep.mubr.bf16.mxu1 %v511_v27 }
 0x14d   :  { %1336 = vmatmul.mubr.bf16.gmra.mxu1 %v512_v35 }
 0x14e   :  { %1339 = vmatprep.mubr.bf16.mxu1 %v513_v36 }
 0x155   :  { %1340 = vmatmul.mubr.bf16.gmra.mxu1 %v514_v39 }
 0x1b5   :  { %v1313_v40 = vpop.f32.mrf.mxu1 }
 0x1b6   :  { %v629_v43 = vadd.f32 %v1313_v40, %v1627_v41 }
 0x1b7   :  { %v620_v42 = vpop.f32.mrf.mxu1 }
 0x1b8   :  { %v621_v45 = vadd.f32 %v1627_v41, %v620_v42  ;;  %v749_v48 = vmax.f32 %v629_v43, 0.0 }
 0x1b9   :  { %v1314_v44 = vpop.f32.mrf.mxu1 }
 0x1ba   :  { %v632_v46 = vadd.f32 %v1314_v44, %v1627_v41  ;;  %v747_v51 = vmax.f32 %v621_v45, 0.0 }
 0x1bb   :  { %v623_v47 = vpop.f32.mrf.mxu1 }
 0x1bc   :  { %v750_v49 = vmax.f32 %v632_v46, 0.0  ;;  %v624_v50 = vadd.f32 %v1627_v41, %v623_v47 }
 0x1be   :  { %v1072_v52 = vpack.c.bf16 %v750_v49, %v749_v48  ;;  %v748_v53 = vmax.f32 %v624_v50, 0.0 }
 0x1c0   :  { %1144 = vst [vmem:[%s1713_s4 + $0x8] sm:$0xff] %v1072_v52   ;;  %v1067_v54 = vpack.c.bf16 %v748_v53, %v747_v51 }
 0x1c2   :  { %1068 = vst [vmem:[%s1713_s4] sm:$0xff] %v1067_v54  }
 0x1c5   :  { %v1317_v55 = vpop.f32.mrf.mxu1 }
 0x1c6   :  { %v645_v57 = vadd.f32 %v1317_v55, %v1627_v41 }
 0x1c7   :  { %v636_v56 = vpop.f32.mrf.mxu1 }
 0x1c8   :  { %v637_v59 = vadd.f32 %v1627_v41, %v636_v56  ;;  %v753_v62 = vmax.f32 %v645_v57, 0.0 }
 0x1c9   :  { %v1318_v58 = vpop.f32.mrf.mxu1 }
 0x1ca   :  { %v648_v60 = vadd.f32 %v1318_v58, %v1627_v41  ;;  %v751_v1 = vmax.f32 %v637_v59, 0.0 }
 0x1cb   :  { %v639_v61 = vpop.f32.mrf.mxu1 }
 0x1cc   :  { %v754_v63 = vmax.f32 %v648_v60, 0.0  ;;  %v640_v0 = vadd.f32 %v1627_v41, %v639_v61 }
 0x1ce   :  { %v1082_v2 = vpack.c.bf16 %v754_v63, %v753_v62  ;;  %v752_v3 = vmax.f32 %v640_v0, 0.0 }
 0x1d0   :  { %1146 = vst [vmem:[%s1713_s4 + $0x18] sm:$0xff] %v1082_v2   ;;  %v1077_v4 = vpack.c.bf16 %v752_v3, %v751_v1 }
 0x1d2   :  { %1145 = vst [vmem:[%s1713_s4 + $0x10] sm:$0xff] %v1077_v4  }
 0x1d5   :  { %v1321_v5 = vpop.f32.mrf.mxu1 }
 0x1d6   :  { %v661_v7 = vadd.f32 %v1321_v5, %v1627_v41 }
 0x1d7   :  { %v652_v6 = vpop.f32.mrf.mxu1 }
 0x1d8   :  { %v653_v9 = vadd.f32 %v1627_v41, %v652_v6  ;;  %v757_v12 = vmax.f32 %v661_v7, 0.0 }
 0x1d9   :  { %v1322_v8 = vpop.f32.mrf.mxu1 }
 0x1da   :  { %v664_v10 = vadd.f32 %v1322_v8, %v1627_v41  ;;  %v755_v15 = vmax.f32 %v653_v9, 0.0 }
 0x1db   :  { %v655_v11 = vpop.f32.mrf.mxu1 }
 0x1dc   :  { %v758_v13 = vmax.f32 %v664_v10, 0.0  ;;  %v656_v14 = vadd.f32 %v1627_v41, %v655_v11 }
 0x1de   :  { %v1092_v16 = vpack.c.bf16 %v758_v13, %v757_v12  ;;  %v756_v17 = vmax.f32 %v656_v14, 0.0 }
 0x1e0   :  { %1148 = vst [vmem:[%s1713_s4 + $0x28] sm:$0xff] %v1092_v16   ;;  %v1087_v18 = vpack.c.bf16 %v756_v17, %v755_v15 }
 0x1e2   :  { %1147 = vst [vmem:[%s1713_s4 + $0x20] sm:$0xff] %v1087_v18  }
 0x1e5   :  { %v1325_v19 = vpop.f32.mrf.mxu1 }
 0x1e6   :  { %v677_v21 = vadd.f32 %v1325_v19, %v1627_v41 }
 0x1e7   :  { %v668_v20 = vpop.f32.mrf.mxu1 }
 0x1e8   :  { %v669_v23 = vadd.f32 %v1627_v41, %v668_v20  ;;  %v761_v26 = vmax.f32 %v677_v21, 0.0 }
 0x1e9   :  { %v1326_v22 = vpop.f32.mrf.mxu1 }
 0x1ea   :  { %v680_v24 = vadd.f32 %v1326_v22, %v1627_v41  ;;  %v759_v29 = vmax.f32 %v669_v23, 0.0 }
 0x1eb   :  { %v671_v25 = vpop.f32.mrf.mxu1 }
 0x1ec   :  { %v762_v27 = vmax.f32 %v680_v24, 0.0  ;;  %v672_v28 = vadd.f32 %v1627_v41, %v671_v25 }
 0x1ee   :  { %v1102_v30 = vpack.c.bf16 %v762_v27, %v761_v26  ;;  %v760_v32 = vmax.f32 %v672_v28, 0.0 }
 0x1f0   :  { %1150 = vst [vmem:[%s1713_s4 + $0x38] sm:$0xff] %v1102_v30   ;;  %v1097_v33 = vpack.c.bf16 %v760_v32, %v759_v29 }
 0x1f2   :  { %1149 = vst [vmem:[%s1713_s4 + $0x30] sm:$0xff] %v1097_v33  }
 0x1f5   :  { %v1329_v34 = vpop.f32.mrf.mxu1 }
 0x1f6   :  { %v693_v36 = vadd.f32 %v1329_v34, %v1627_v41 }
 0x1f7   :  { %v684_v35 = vpop.f32.mrf.mxu1 }
 0x1f8   :  { %v685_v31 = vadd.f32 %v1627_v41, %v684_v35  ;;  %v765_v40 = vmax.f32 %v693_v36, 0.0 }
 0x1f9   :  { %v1330_v38 = vpop.f32.mrf.mxu1 }
 0x1fa   :  { %v696_v37 = vadd.f32 %v1330_v38, %v1627_v41  ;;  %v763_v44 = vmax.f32 %v685_v31, 0.0 }
 0x1fb   :  { %v687_v39 = vpop.f32.mrf.mxu1 }
 0x1fc   :  { %v766_v42 = vmax.f32 %v696_v37, 0.0  ;;  %v688_v43 = vadd.f32 %v1627_v41, %v687_v39 }
 0x1fe   :  { %v1112_v45 = vpack.c.bf16 %v766_v42, %v765_v40  ;;  %v764_v46 = vmax.f32 %v688_v43, 0.0 }
 0x200   :  { %1152 = vst [vmem:[%s1713_s4 + $0x48] sm:$0xff] %v1112_v45   ;;  %v1107_v47 = vpack.c.bf16 %v764_v46, %v763_v44 }
 0x202   :  { %1151 = vst [vmem:[%s1713_s4 + $0x40] sm:$0xff] %v1107_v47  }
 0x205   :  { %v1333_v48 = vpop.f32.mrf.mxu1 }
 0x206   :  { %v709_v50 = vadd.f32 %v1333_v48, %v1627_v41 }
 0x207   :  { %v700_v49 = vpop.f32.mrf.mxu1 }
 0x208   :  { %v701_v52 = vadd.f32 %v1627_v41, %v700_v49  ;;  %v769_v55 = vmax.f32 %v709_v50, 0.0 }
 0x209   :  { %v1334_v51 = vpop.f32.mrf.mxu1 }
 0x20a   :  { %v712_v53 = vadd.f32 %v1334_v51, %v1627_v41  ;;  %v767_v59 = vmax.f32 %v701_v52, 0.0 }
 0x20b   :  { %v703_v54 = vpop.f32.mrf.mxu1 }
 0x20c   :  { %v770_v56 = vmax.f32 %v712_v53, 0.0  ;;  %v704_v57 = vadd.f32 %v1627_v41, %v703_v54 }
 0x20d   :  { %v1337_v58 = vpop.f32.mrf.mxu1 }
 0x20e   :  { %v1122_v60 = vpack.c.bf16 %v770_v56, %v769_v55  ;;  %v768_v61 = vmax.f32 %v704_v57, 0.0  ;;  %v725_v0 = vadd.f32 %v1337_v58, %v1627_v41 }
 0x20f   :  { %v716_v62 = vpop.f32.mrf.mxu1 }
 0x210   :  { %1154 = vst [vmem:[%s1713_s4 + $0x58] sm:$0xff] %v1122_v60   ;;  %v1117_v63 = vpack.c.bf16 %v768_v61, %v767_v59  ;;  %v717_v2 = vadd.f32 %v1627_v41, %v716_v62  ;;  %v773_v5 = vmax.f32 %v725_v0, 0.0 }
 0x211   :  { %v1338_v1 = vpop.f32.mrf.mxu1 }
 0x212   :  { %1153 = vst [vmem:[%s1713_s4 + $0x50] sm:$0xff] %v1117_v63   ;;  %v728_v3 = vadd.f32 %v1338_v1, %v1627_v41  ;;  %v771_v9 = vmax.f32 %v717_v2, 0.0 }
 0x213   :  { %v719_v4 = vpop.f32.mrf.mxu1 }
 0x214   :  { %v774_v6 = vmax.f32 %v728_v3, 0.0  ;;  %v720_v7 = vadd.f32 %v1627_v41, %v719_v4 }
 0x215   :  { %v1341_v8 = vpop.f32.mrf.mxu1 }
 0x216   :  { %v1132_v10 = vpack.c.bf16 %v774_v6, %v773_v5  ;;  %v772_v11 = vmax.f32 %v720_v7, 0.0  ;;  %v741_v14 = vadd.f32 %v1341_v8, %v1627_v41 }
 0x217   :  { %v732_v12 = vpop.f32.mrf.mxu1 }
 0x218   :  { %1156 = vst [vmem:[%s1713_s4 + $0x68] sm:$0xff] %v1132_v10   ;;  %v1127_v13 = vpack.c.bf16 %v772_v11, %v771_v9  ;;  %v733_v16 = vadd.f32 %v1627_v41, %v732_v12  ;;  %v777_v19 = vmax.f32 %v741_v14, 0.0 }
 0x219   :  { %v1342_v15 = vpop.f32.mrf.mxu1 }
 0x21a   :  { %1155 = vst [vmem:[%s1713_s4 + $0x60] sm:$0xff] %v1127_v13   ;;  %v744_v17 = vadd.f32 %v1342_v15, %v1627_v41  ;;  %v775_v22 = vmax.f32 %v733_v16, 0.0 }
 0x21b   :  { %v735_v18 = vpop.f32.mrf.mxu1 }
 0x21c   :  { %v778_v20 = vmax.f32 %v744_v17, 0.0  ;;  %v736_v21 = vadd.f32 %v1627_v41, %v735_v18 }
 0x21e   :  { %v1142_v23 = vpack.c.bf16 %v778_v20, %v777_v19  ;;  %v776_v24 = vmax.f32 %v736_v21, 0.0 }
 0x220   :  { %1158 = vst [vmem:[%s1713_s4 + $0x78] sm:$0xff] %v1142_v23   ;;  %v1137_v25 = vpack.c.bf16 %v776_v24, %v775_v22 }
 0x222   :  { %1157 = vst [vmem:[%s1713_s4 + $0x70] sm:$0xff] %v1137_v25  }

</bundles_post_ra>
